<compile_context>
chip_gen: v6e
topology: v6e:2x2x1
jax: 0.10.0
libtpu: 0.0.40
codegen_flags: <defaults>
</compile_context>

<pallas_src>
import math
import functools

import jax
import jax.numpy as jnp
from jax import lax
from jax.experimental import pallas as pl
from jax.experimental.pallas import tpu as pltpu


def _linear_attn_kernel(q_ref, k_ref, v_ref, we_ref, be_ref, wf_ref, bf_ref,
                        o_ref, kp_ref, vp_ref):
    # q_ref: (TQ, d)        -- current Q row tile (batch dim squeezed)
    # k_ref, v_ref: (N, d)  -- full K / V for this batch
    # we_ref, wf_ref: (kproj, N) projection weights (scale folded into we)
    # be_ref, bf_ref: (kproj, 1) f32 biases (scale folded into be)
    # o_ref: (TQ, d)
    # kp_ref, vp_ref: VMEM scratch (kproj, d) -- per-batch projected K / V

    # --- per-batch phase: project K and V once (first Q tile of this batch) ---
    @pl.when(pl.program_id(1) == 0)
    def _():
        kp = jnp.dot(we_ref[...], k_ref[...],
                     preferred_element_type=jnp.float32) + be_ref[...]
        vp = jnp.dot(wf_ref[...], v_ref[...],
                     preferred_element_type=jnp.float32) + bf_ref[...]
        kp_ref[...] = kp.astype(kp_ref.dtype)
        vp_ref[...] = vp.astype(vp_ref.dtype)

    # --- per-Q-tile phase ---
    # scores = Q @ K' / sqrt(dim): contract d (last) with d (last) -> (TQ, kproj)
    scores = lax.dot_general(
        q_ref[...], kp_ref[...],
        dimension_numbers=(((1,), (1,)), ((), ())),
        preferred_element_type=jnp.float32)

    # numerically stable softmax over the compressed (kproj) axis, in f32
    m = jnp.max(scores, axis=-1, keepdims=True)
    e = jnp.exp(scores - m)
    p = e * pl.reciprocal(jnp.sum(e, axis=-1, keepdims=True), approx=True)

    # TODO(synk): dropout with p > 0 (training mode) not implemented (identity here).

    # out = P @ V'  -> (TQ, d); vp is already in (kproj, d) layout, no transpose.
    out = jnp.dot(p.astype(vp_ref.dtype), vp_ref[...],
                  preferred_element_type=jnp.float32)
    o_ref[...] = out.astype(o_ref.dtype)


def _pick_tq(N, target=256):
    """Largest Q-row tile <= target that divides N and is a multiple of 8."""
    if N <= target:
        return N
    t = (min(target, N) // 8) * 8
    while t >= 8:
        if N % t == 0:
            return t
        t -= 8
    return N


def linear_attention_head(Q, K, V, W_E, b_E, W_F, b_F, dim, *,
                          compute_dtype=None, tq=256):
    """Q, K, V: (B, N, d); W_E/W_F: (kproj, N); b_E/b_F: (kproj,).

    compute_dtype: dtype used for MXU operands (e.g. jnp.bfloat16 for 2x MXU
    throughput on v5e/v6e/v7x); accumulation and softmax stay in f32.
    """
    B, N, d = Q.shape
    kproj = W_E.shape[0]
    out_dtype = Q.dtype
    cdt = compute_dtype if compute_dtype is not None else Q.dtype

    # Fold the 1/sqrt(dim) score scale into the E-projection parameters once.
    inv_sqrt_dim = 1.0 / math.sqrt(float(dim))
    We = (W_E.astype(jnp.float32) * inv_sqrt_dim).astype(cdt)
    Be = (b_E.astype(jnp.float32) * inv_sqrt_dim).reshape(kproj, 1)  # f32
    Wf = W_F.astype(cdt)
    Bf = b_F.astype(jnp.float32).reshape(kproj, 1)                   # f32

    Qc = Q.astype(cdt)
    Kc = K.astype(cdt)
    Vc = V.astype(cdt)

    TQ = _pick_tq(N, tq)
    nq = N // TQ

    # VMEM budget (double-buffered inputs/outputs + weights + scratch) with
    # headroom; clamped so it is valid on v5e (16 MiB scoped default) up to
    # v7x (64 MiB physical per TC).
    csz = jnp.dtype(cdt).itemsize
    osz = jnp.dtype(out_dtype).itemsize
    est = (2 * TQ * d * csz              # Q tile
           + 2 * 2 * N * d * csz         # K, V (full-N blocks)
           + 2 * 2 * kproj * N * csz     # W_E, W_F
           + 2 * 2 * kproj * 4           # biases (f32)
           + 2 * TQ * d * osz            # out tile
           + 2 * kproj * d * csz)        # kp / vp scratch
    vmem_limit = min(max(2 * est + (2 << 20), 32 << 20), 100 << 20)

    grid_spec = pltpu.PrefetchScalarGridSpec(
        num_scalar_prefetch=0,
        grid=(B, nq),
        in_specs=[
            pl.BlockSpec((None, TQ, d), lambda b, q: (b, q, 0)),   # Q (tiled)
            pl.BlockSpec((None, N, d), lambda b, q: (b, 0, 0)),    # K (per batch)
            pl.BlockSpec((None, N, d), lambda b, q: (b, 0, 0)),    # V (per batch)
            pl.BlockSpec((kproj, N), lambda b, q: (0, 0)),         # W_E (resident)
            pl.BlockSpec((kproj, 1), lambda b, q: (0, 0)),         # b_E
            pl.BlockSpec((kproj, N), lambda b, q: (0, 0)),         # W_F (resident)
            pl.BlockSpec((kproj, 1), lambda b, q: (0, 0)),         # b_F
        ],
        out_specs=pl.BlockSpec((None, TQ, d), lambda b, q: (b, q, 0)),
        scratch_shapes=[
            pltpu.VMEM((kproj, d), cdt),   # kp = (K'/sqrt(dim))^T
            pltpu.VMEM((kproj, d), cdt),   # vp = V'
        ],
    )

    return pl.pallas_call(
        _linear_attn_kernel,
        out_shape=jax.ShapeDtypeStruct((B, N, d), out_dtype),
        grid_spec=grid_spec,
        compiler_params=pltpu.CompilerParams(
            dimension_semantics=("parallel", "arbitrary"),
            vmem_limit_bytes=int(vmem_limit)),
    )(Qc, Kc, Vc, We, Be, Wf, Bf)


def _reference(Q, K, V, W_E, b_E, W_F, b_F, dim):
    # Pure-JAX reference mirroring the PyTorch forward.
    Kp = jnp.einsum('bnd,kn->bdk', K, W_E) + b_E          # E(K^T): (B, d, k)
    S = jnp.einsum('bnd,bdk->bnk', Q, Kp) / math.sqrt(dim)
    P = jax.nn.softmax(S, axis=-1)
    Vp = jnp.einsum('bnd,kn->bdk', V, W_F) + b_F          # F(V^T): (B, d, k)
    Vp = jnp.swapaxes(Vp, 1, 2)                           # (B, k, d)
    return jnp.einsum('bnk,bkd->bnd', P, Vp)


if __name__ == "__main__":
    B, N, d, kproj = 2, 16, 32, 8   # batch, seq, head-dim, Linformer compressed dim

    key = jax.random.PRNGKey(0)
    kq, kk, kv, kwe, kbe, kwf, kbf = jax.random.split(key, 7)

    Q = jax.random.normal(kq, (B, N, d), dtype=jnp.float32)
    K = jax.random.normal(kk, (B, N, d), dtype=jnp.float32)
    V = jax.random.normal(kv, (B, N, d), dtype=jnp.float32)

    # nn.Linear(N, kproj)-shaped projections, deterministic init.
    bound = 1.0 / math.sqrt(N)
    W_E = jax.random.uniform(kwe, (kproj, N), minval=-bound, maxval=bound,
                             dtype=jnp.float32)
    b_E = jax.random.uniform(kbe, (kproj,), minval=-bound, maxval=bound,
                             dtype=jnp.float32)
    W_F = jax.random.uniform(kwf, (kproj, N), minval=-bound, maxval=bound,
                             dtype=jnp.float32)
    b_F = jax.random.uniform(kbf, (kproj,), minval=-bound, maxval=bound,
                             dtype=jnp.float32)

    ref = _reference(Q, K, V, W_E, b_E, W_F, b_F, dim=d)

    # f32 path (approx reciprocal in the softmax -> modest tolerance).
    out = linear_attention_head(Q, K, V, W_E, b_E, W_F, b_F, dim=d)
    out = jax.block_until_ready(out)
    assert out.shape == (B, N, d)
    assert jnp.allclose(out, ref, atol=1e-2, rtol=1e-2), "f32 mismatch vs reference"

    # bf16 operands / f32 accumulation path (recommended on TPU for throughput).
    out_bf = linear_attention_head(Q, K, V, W_E, b_E, W_F, b_F, dim=d,
                                   compute_dtype=jnp.bfloat16)
    out_bf = jax.block_until_ready(out_bf)
    assert jnp.allclose(out_bf.astype(jnp.float32), ref,
                        atol=1e-1, rtol=1e-1), "bf16 mismatch vs reference"

    print("KERNEL_OK")
</pallas_src>

<mosaic_0001>
module attributes {stable_mosaic.version = 11 : i64} {
  func.func @_linear_attn_kernel(%arg0: i32, %arg1: i32, %arg2: memref<1x16x32xf32, #tpu.memory_space<vmem>>, %arg3: memref<1x16x32xf32, #tpu.memory_space<vmem>>, %arg4: memref<1x16x32xf32, #tpu.memory_space<vmem>>, %arg5: memref<8x16xf32, #tpu.memory_space<vmem>>, %arg6: memref<8x1xf32, #tpu.memory_space<vmem>>, %arg7: memref<8x16xf32, #tpu.memory_space<vmem>>, %arg8: memref<8x1xf32, #tpu.memory_space<vmem>>, %arg9: memref<1x16x32xf32, #tpu.memory_space<vmem>>, %arg10: memref<8x32xf32, #tpu.memory_space<vmem>>, %arg11: memref<8x32xf32, #tpu.memory_space<vmem>>) attributes {dimension_semantics = [#tpu.dimension_semantics<parallel>, #tpu.dimension_semantics<arbitrary>], iteration_bounds = array<i64: 2, 1>, scalar_prefetch = 0 : i64, scratch_operands = 2 : i64, tpu.core_type = #tpu.core_type<tc>, window_params = [{transform_indices = @transform_0, window_bounds = array<i64: 1, 16, 32>}, {transform_indices = @transform_1, window_bounds = array<i64: 1, 16, 32>}, {transform_indices = @transform_2, window_bounds = array<i64: 1, 16, 32>}, {pipeline_mode = #tpu.pipeline_mode<synchronous>, transform_indices = @transform_3, window_bounds = array<i64: 8, 16>}, {pipeline_mode = #tpu.pipeline_mode<synchronous>, transform_indices = @transform_4, window_bounds = array<i64: 8, 1>}, {pipeline_mode = #tpu.pipeline_mode<synchronous>, transform_indices = @transform_5, window_bounds = array<i64: 8, 16>}, {pipeline_mode = #tpu.pipeline_mode<synchronous>, transform_indices = @transform_6, window_bounds = array<i64: 8, 1>}, {transform_indices = @transform_7, window_bounds = array<i64: 1, 16, 32>}]} {
    %c0_i32 = arith.constant 0 : i32
    %0 = arith.cmpi eq, %arg1, %c0_i32 : i32
    %1 = arith.extui %0 : i1 to i32
    %c0_i32_0 = arith.constant 0 : i32
    %2 = arith.cmpi ne, %1, %c0_i32_0 : i32
    scf.if %2 {
      %c0_13 = arith.constant 0 : index
      %c0_14 = arith.constant 0 : index
      %22 = vector.load %arg5[%c0_13, %c0_14] : memref<8x16xf32, #tpu.memory_space<vmem>>, vector<8x16xf32>
      %c0_15 = arith.constant 0 : index
      %c0_16 = arith.constant 0 : index
      %c0_17 = arith.constant 0 : index
      %23 = vector.load %arg3[%c0_15, %c0_16, %c0_17] : memref<1x16x32xf32, #tpu.memory_space<vmem>>, vector<1x16x32xf32>
      %24 = vector.shape_cast %23 : vector<1x16x32xf32> to vector<16x32xf32>
      %cst_18 = arith.constant dense<0.000000e+00> : vector<8x32xf32>
      %25 = tpu.matmul %22, %24, %cst_18 {dimension_numbers = #tpu.dot_dimension_numbers<[1], [0], [0], [1], [0, 0, 1, 1], [], []>} : vector<8x16xf32>, vector<16x32xf32>, vector<8x32xf32> -> vector<8x32xf32>
      %c0_19 = arith.constant 0 : index
      %c0_20 = arith.constant 0 : index
      %26 = vector.load %arg6[%c0_19, %c0_20] : memref<8x1xf32, #tpu.memory_space<vmem>>, vector<8x1xf32>
      %27 = vector.broadcast %26 : vector<8x1xf32> to vector<8x32xf32>
      %28 = arith.addf %25, %27 : vector<8x32xf32>
      %c0_21 = arith.constant 0 : index
      %c0_22 = arith.constant 0 : index
      %29 = vector.load %arg7[%c0_21, %c0_22] : memref<8x16xf32, #tpu.memory_space<vmem>>, vector<8x16xf32>
      %c0_23 = arith.constant 0 : index
      %c0_24 = arith.constant 0 : index
      %c0_25 = arith.constant 0 : index
      %30 = vector.load %arg4[%c0_23, %c0_24, %c0_25] : memref<1x16x32xf32, #tpu.memory_space<vmem>>, vector<1x16x32xf32>
      %31 = vector.shape_cast %30 : vector<1x16x32xf32> to vector<16x32xf32>
      %cst_26 = arith.constant dense<0.000000e+00> : vector<8x32xf32>
      %32 = tpu.matmul %29, %31, %cst_26 {dimension_numbers = #tpu.dot_dimension_numbers<[1], [0], [0], [1], [0, 0, 1, 1], [], []>} : vector<8x16xf32>, vector<16x32xf32>, vector<8x32xf32> -> vector<8x32xf32>
      %c0_27 = arith.constant 0 : index
      %c0_28 = arith.constant 0 : index
      %33 = vector.load %arg8[%c0_27, %c0_28] : memref<8x1xf32, #tpu.memory_space<vmem>>, vector<8x1xf32>
      %34 = vector.broadcast %33 : vector<8x1xf32> to vector<8x32xf32>
      %35 = arith.addf %32, %34 : vector<8x32xf32>
      %c0_29 = arith.constant 0 : index
      %c0_30 = arith.constant 0 : index
      %36 = vector.load %arg10[%c0_29, %c0_30] : memref<8x32xf32, #tpu.memory_space<vmem>>, vector<8x32xf32>
      tpu.vector_store %arg10[%c0_29, %c0_30], %28 {strides = array<i32>} : memref<8x32xf32, #tpu.memory_space<vmem>>, vector<8x32xf32>,
      %c0_31 = arith.constant 0 : index
      %c0_32 = arith.constant 0 : index
      %37 = vector.load %arg11[%c0_31, %c0_32] : memref<8x32xf32, #tpu.memory_space<vmem>>, vector<8x32xf32>
      tpu.vector_store %arg11[%c0_31, %c0_32], %35 {strides = array<i32>} : memref<8x32xf32, #tpu.memory_space<vmem>>, vector<8x32xf32>,
    } else {
    }
    %c0 = arith.constant 0 : index
    %c0_1 = arith.constant 0 : index
    %c0_2 = arith.constant 0 : index
    %3 = vector.load %arg2[%c0, %c0_1, %c0_2] : memref<1x16x32xf32, #tpu.memory_space<vmem>>, vector<1x16x32xf32>
    %4 = vector.shape_cast %3 : vector<1x16x32xf32> to vector<16x32xf32>
    %c0_3 = arith.constant 0 : index
    %c0_4 = arith.constant 0 : index
    %5 = vector.load %arg10[%c0_3, %c0_4] : memref<8x32xf32, #tpu.memory_space<vmem>>, vector<8x32xf32>
    %cst = arith.constant dense<0.000000e+00> : vector<16x8xf32>
    %6 = tpu.matmul %4, %5, %cst {dimension_numbers = #tpu.dot_dimension_numbers<[1], [1], [0], [0], [0, 0, 1, 0], [], []>} : vector<16x32xf32>, vector<8x32xf32>, vector<16x8xf32> -> vector<16x8xf32>
    %cst_5 = arith.constant dense<0xFF800000> : vector<16xf32>
    %7 = vector.multi_reduction <maximumf>, %6, %cst_5 [1] : vector<16x8xf32> to vector<16xf32>
    %8 = vector.shape_cast %7 : vector<16xf32> to vector<16x1xf32>
    %9 = vector.broadcast %8 : vector<16x1xf32> to vector<16x8xf32>
    %10 = arith.subf %6, %9 : vector<16x8xf32>
    %11 = math.exp %10 : vector<16x8xf32>
    %cst_6 = arith.constant dense<0.000000e+00> : vector<16xf32>
    %12 = vector.multi_reduction <add>, %11, %cst_6 [1] : vector<16x8xf32> to vector<16xf32>
    %13 = vector.shape_cast %12 : vector<16xf32> to vector<16x1xf32>
    %14 = tpu.reciprocal %13 {approx = true} : vector<16x1xf32> -> vector<16x1xf32>
    %15 = vector.broadcast %14 : vector<16x1xf32> to vector<16x8xf32>
    %16 = arith.mulf %11, %15 : vector<16x8xf32>
    %c0_7 = arith.constant 0 : index
    %c0_8 = arith.constant 0 : index
    %17 = vector.load %arg11[%c0_7, %c0_8] : memref<8x32xf32, #tpu.memory_space<vmem>>, vector<8x32xf32>
    %cst_9 = arith.constant dense<0.000000e+00> : vector<16x32xf32>
    %18 = tpu.matmul %16, %17, %cst_9 {dimension_numbers = #tpu.dot_dimension_numbers<[1], [0], [0], [1], [0, 0, 1, 1], [], []>} : vector<16x8xf32>, vector<8x32xf32>, vector<16x32xf32> -> vector<16x32xf32>
    %c0_10 = arith.constant 0 : index
    %c0_11 = arith.constant 0 : index
    %c0_12 = arith.constant 0 : index
    %19 = vector.load %arg9[%c0_10, %c0_11, %c0_12] : memref<1x16x32xf32, #tpu.memory_space<vmem>>, vector<1x16x32xf32>
    %20 = vector.shape_cast %19 : vector<1x16x32xf32> to vector<16x32xf32>
    %21 = vector.shape_cast %18 : vector<16x32xf32> to vector<1x16x32xf32>
    tpu.vector_store %arg9[%c0_10, %c0_11, %c0_12], %21 {strides = array<i32>} : memref<1x16x32xf32, #tpu.memory_space<vmem>>, vector<1x16x32xf32>,
    return
  }
  func.func @transform_0(%arg0: i32, %arg1: i32) -> (i32, i32, i32) {
    %c0_i32 = arith.constant 0 : i32
    %c0_i32_0 = arith.constant 0 : i32
    return %arg0, %arg1, %c0_i32 : i32, i32, i32
  }
  func.func @transform_1(%arg0: i32, %arg1: i32) -> (i32, i32, i32) {
    %c0_i32 = arith.constant 0 : i32
    %c0_i32_0 = arith.constant 0 : i32
    %c0_i32_1 = arith.constant 0 : i32
    return %arg0, %c0_i32, %c0_i32_0 : i32, i32, i32
  }
  func.func @transform_2(%arg0: i32, %arg1: i32) -> (i32, i32, i32) {
    %c0_i32 = arith.constant 0 : i32
    %c0_i32_0 = arith.constant 0 : i32
    %c0_i32_1 = arith.constant 0 : i32
    return %arg0, %c0_i32, %c0_i32_0 : i32, i32, i32
  }
  func.func @transform_3(%arg0: i32, %arg1: i32) -> (i32, i32) {
    %c0_i32 = arith.constant 0 : i32
    %c0_i32_0 = arith.constant 0 : i32
    %c0_i32_1 = arith.constant 0 : i32
    return %c0_i32, %c0_i32_0 : i32, i32
  }
  func.func @transform_4(%arg0: i32, %arg1: i32) -> (i32, i32) {
    %c0_i32 = arith.constant 0 : i32
    %c0_i32_0 = arith.constant 0 : i32
    %c0_i32_1 = arith.constant 0 : i32
    return %c0_i32, %c0_i32_0 : i32, i32
  }
  func.func @transform_5(%arg0: i32, %arg1: i32) -> (i32, i32) {
    %c0_i32 = arith.constant 0 : i32
    %c0_i32_0 = arith.constant 0 : i32
    %c0_i32_1 = arith.constant 0 : i32
    return %c0_i32, %c0_i32_0 : i32, i32
  }
  func.func @transform_6(%arg0: i32, %arg1: i32) -> (i32, i32) {
    %c0_i32 = arith.constant 0 : i32
    %c0_i32_0 = arith.constant 0 : i32
    %c0_i32_1 = arith.constant 0 : i32
    return %c0_i32, %c0_i32_0 : i32, i32
  }
  func.func @transform_7(%arg0: i32, %arg1: i32) -> (i32, i32, i32) {
    %c0_i32 = arith.constant 0 : i32
    %c0_i32_0 = arith.constant 0 : i32
    return %arg0, %arg1, %c0_i32 : i32, i32, i32
  }
}

</mosaic_0001>

<bundles_post_ra>
// kernel: tpu_custom_call.1
= control target key start
LH: loop header
LB: loop body
LE: loop exit
PB: predicated region body
PF: predicated region fallthrough
CT: control target
= control target key end

     0   :  { %s1540_s0 = inlined_call_operand.hbm [shape: f32[2,16,32], index: 0, kind: input, shape index: {}]   ;;  %s1541_s1 = inlined_call_operand.hbm [shape: f32[2,16,32], index: 1, kind: input, shape index: {}]   ;;  %s1542_s2 = inlined_call_operand.hbm [shape: f32[2,16,32], index: 2, kind: input, shape index: {}]   ;;  %s1543_s3 = inlined_call_operand.vmem [shape: f32[8,16], index: 3, kind: input, shape index: {}]   ;;  %s1544_s4 = inlined_call_operand.vmem [shape: f32[8,1], index: 4, kind: input, shape index: {}]   ;;  %s1545_s5 = inlined_call_operand.vmem [shape: f32[8,16], index: 5, kind: input, shape index: {}]   ;;  %s1546_s6 = inlined_call_operand.vmem [shape: f32[8,1], index: 6, kind: input, shape index: {}]   ;;  %s1547_s7 = inlined_call_operand.hbm [shape: f32[2,16,32], index: 7, kind: output, shape index: {}]  }
   0x1   :  { %1558 = sst [smem:[#allocation20_spill]] %s1541_s1 }
   0x2   :  { %1559 = sst [smem:[#allocation21_spill]] %s1547_s7 }
   0x3   :  { %12 = vsyncpa [#allocation5], 0 }
   0x4   :  { %14 = vsyncpa [#allocation5 + $0x1], 0 }
   0x5   :  { %15 = vsyncpa [#allocation8], 0 }
   0x6   :  { %17 = vsyncpa [#allocation8 + $0x1], 0 }
   0x7   :  { %18 = vsyncpa [#allocation6], 0 }
   0x8   :  { %20 = vsyncpa [#allocation6 + $0x1], 0  ;;  %s1287_s24 = smov 0   ;;  %s1289_s25 = smov 0  }
   0x9   :  { %s1291_s26 = smov 0   ;;  %s1293_s27 = smov 0  }
   0xa   :  { %s1295_s28 = smov 0   ;;  %s1297_s29 = smov 0  }
   0xb LB: > { %1560 = sst [smem:[#allocation14_spill]] %s1214_s24  ;;  %s1318_s30 = sadd.s32 4294967295, %s1234_s29   ;;  %s1234_s29 = sphi %s1297_s29, %s26_s29   ;;  %s1230_s28 = sphi %s1295_s28, %s1582_s28   ;;  %s1226_s27 = sphi %s1293_s27, %s1581_s27   ;;  %s1222_s26 = sphi %s1291_s26, %s1585_s26   ;;  %s1218_s25 = sphi %s1289_s25, %s1584_s25   ;;  %s1214_s24 = sphi %s1287_s24, %s1583_s24  }
   0xc   : > { %1561 = sst [smem:[#allocation15_spill]] %s1230_s28  ;;  %s908_s8 = sadd.s32 4294967294, %s1234_s29  }
   0xd   : > { %s38_s9 = sadd.s32 1, %s1230_s28  ;;  %s47_s10 = sadd.s32 1, %s1222_s26 }
   0xe   : > { %p40_p0 = scmp.ge.s32.totalorder %s38_s9, 2  ;;  %p54_p1 = scmp.ne.s32.totalorder %s1222_s26, %s1218_s25 }
   0xf   : > { %p55_p2 = scmp.eq.s32.totalorder %s1234_s29, 0  ;;  %p60_p3 = scmp.ne.s32.totalorder %s1218_s25, %s1214_s24 }
  0x10   : > { %s1587_s9 = smov (%p40_p0, %s38_s9), 0  ;;  %p61_p5 = scmp.eq.s32.totalorder %s1318_s30, 0 }
  0x11   : > { %1562 = sst [smem:[#allocation16_spill]] %s1587_s9  ;;  %p1330_p4 = por %p55_p2, %p54_p1 }
  0x12   : > { %s42_s12 = ssub.s32 %s1230_s28, %s1587_s9  ;;  %p222_p6 = scmp.eq.s32.totalorder %s1318_s30, 1 }
  0x13   : > { %p45_p7 = scmp.eq.s32.totalorder %s42_s12, 0  ;;  %p1338_p8 = por %p61_p5, %p60_p3 }
  0x14   : > { %p1342_p9 = por %p222_p6, %p54_p1  ;;  %p228_p10 = scmp.eq.s32.totalorder %s908_s8, 1 }
  0x15   : > { %s1347_s15 = scalar_select %p45_p7, %s1222_s26, %s47_s10  }
  0x16   : > { %s1565_s14 = scalar_select %p1342_p9, 1, 0 }
  0x17   : > { %1567 = sst [smem:[#allocation18_spill]] %s1347_s15  ;;  %p1349_p11 = por %p228_p10, %p60_p3 }
  0x18   : > { %1566 = sst [smem:[#allocation17_spill]] %s1565_s14  ;;  %p999_p13 = scmp.lt.s32.totalorder %s1234_s29, 2 }
  0x19   : > { %s1568_s16 = scalar_select %p1349_p11, 1, 0 }
  0x1a   : > { %s1548_s17 = sand.u32 1, %s1222_s26   ;;  %s1361_s19 = sshll.u32 %s1230_s28, 8 }
  0x1b   : > { %1569 = sst [smem:[#allocation19_spill]] %s1568_s16  ;;  %s1358_s18 = sshll.u32 %s1548_s17, 4 }
  0x1c   : > { %p1365_p0 = pnand %p999_p13, %p1330_p4  ;;  %s283_s21 = sand.u32 1, %s1234_s29  }
  0x1d   : > { %s1571_s1 = sld [smem:[#allocation20_spill]]  ;;  %s287_s10 = scalar_lea.vmem [#allocation7], %s1358_s18 }
  0x1e   : > { %s294_s12 = sshll.u32 %s287_s10, 4  ;;  %p920_p1 = scmp.ge.s32.totalorder %s1234_s29, 1  ;;  %s295_s12 = int_to_ptr.vmem [resolvable:$true] %s294_s12 }
  0x1f   : > { %p323_p2 = scmp.lt.s32.totalorder %s1234_s29, 3  ;;  %s1377_s17 = scalar_lea.sflag [#allocation8], %s283_s21 }
  0x20   : > { %p1068_p3 = pneg %p1365_p0  ;;  %s1079_s11 = scalar_lea.vmem %s295_s12, 256 }
  0x21   : > { %p1080_p4 = scmp.ne.s32.totalorder %s295_s12, %s1079_s11  ;;  %s1236_s9 = smov [#allocation7]  }
  0x22   : > { %s1084_s28 = sshll.u32 %s1236_s9, 4  ;;  %s1085_s28 = int_to_ptr.vmem [resolvable:$false] %s1084_s28 }
  0x23   : > { %s293_s8 = scalar_lea.hbm %s1571_s1, %s1361_s19  ;;  %p1082_p5 = pnand %p1080_p4, %p1068_p3 }
  0x24   : > { %s1086_s22 = scalar_lea.vmem %s1085_s28, 512  ;;  %p1087_p7 = scmp.lt.s32.totalorder %s295_s12, %s1085_s28 }
  0x25   : > { %p1083_p6 = pneg %p1082_p5  ;;  %p1088_p10 = scmp.lt.s32.totalorder %s1086_s22, %s1079_s11 }
  0x27   : > { %p1089_p13 = por %p1088_p10, %p1087_p7 }
  0x29   : > { %p1090_p12 = pnand %p1089_p13, %p1083_p6 }
  0x2b   : > { %1093 = shalt.err (!%p1090_p12)
}
  0x2c   : > { %s1556_s23 = smov 128   ;;  %s1238_s21 = smov 8  }
  0x2d   : > { %991 = dma.hbm_to_vmem [thread:$0]  (!%p1365_p0), %s293_s8, 256, %s295_s12, %s1377_s17, %s1556_s23, %s1556_s23, %s1238_s21  }
  0x2e   : > { %p1394_p4 = pnand %p920_p1, %p323_p2  ;;  %s272_s11 = scalar_lea.hbm %s1540_s0, %s1361_s19 }
  0x2f   : > { %s264_s22 = scalar_lea.vmem [#allocation4], %s1358_s18  ;;  %s314_s24 = scalar_lea.hbm %s1542_s2, %s1361_s19 }
  0x30   : > { %s273_s1 = sshll.u32 %s264_s22, 4  ;;  %s1573_s7 = sand.u32 1, %s1222_s26   ;;  %s274_s1 = int_to_ptr.vmem [resolvable:$true] %s273_s1 }
  0x31   : > { %s261_s14 = scalar_lea.sflag [#allocation5], %s1573_s7  ;;  %s1107_s8 = scalar_lea.vmem %s274_s1, 256 }
  0x32   : > { %p1108_p12 = scmp.ne.s32.totalorder %s274_s1, %s1107_s8  ;;  %s1239_s12 = smov [#allocation4]  }
  0x33   : > { %s1112_s23 = sshll.u32 %s1239_s12, 4  ;;  %s1113_s23 = int_to_ptr.vmem [resolvable:$false] %s1112_s23 }
  0x34   : > { %p1110_p1 = pnand %p1108_p12, %p1068_p3  ;;  %s1114_s9 = scalar_lea.vmem %s1113_s23, 512 }
  0x35   : > { %p1115_p5 = scmp.lt.s32.totalorder %s274_s1, %s1113_s23  ;;  %p1116_p6 = scmp.lt.s32.totalorder %s1114_s9, %s1107_s8 }
  0x36   : > { %p1111_p2 = pneg %p1110_p1 }
  0x37   : > { %p1117_p7 = por %p1116_p6, %p1115_p5 }
  0x39   : > { %p1118_p10 = pnand %p1117_p7, %p1111_p2 }
  0x3b   : > { %1121 = shalt.err (!%p1118_p10)
}
  0x3c   : > { %s1574_s15 = smov 128   ;;  %s308_s7 = scalar_lea.vmem [#allocation9], %s1358_s18 }
  0x3d   : > { %988 = dma.hbm_to_vmem [thread:$0]  (!%p1365_p0), %s272_s11, 256, %s274_s1, %s261_s14, %s1574_s15, %s1574_s15, %s1238_s21  }
  0x3e   : > { %s315_s16 = sshll.u32 %s308_s7, 4  ;;  %s1240_s23 = smov [#allocation9]   ;;  %s316_s16 = int_to_ptr.vmem [resolvable:$true] %s315_s16 }
  0x3f   : > { %s1135_s10 = scalar_lea.vmem %s316_s16, 256  ;;  %s1140_s22 = sshll.u32 %s1240_s23, 4  ;;  %s1141_s22 = int_to_ptr.vmem [resolvable:$false] %s1140_s22 }
  0x40   : > { %p1136_p13 = scmp.ne.s32.totalorder %s316_s16, %s1135_s10  ;;  %s1142_s8 = scalar_lea.vmem %s1141_s22, 512 }
  0x41   : > { %p1143_p2 = scmp.lt.s32.totalorder %s316_s16, %s1141_s22  ;;  %p1144_p5 = scmp.lt.s32.totalorder %s1142_s8, %s1135_s10 }
  0x42   : > { %p1138_p12 = pnand %p1136_p13, %p1068_p3 }
  0x43   : > { %p1145_p6 = por %p1144_p5, %p1143_p2 }
  0x44   : > { %p1139_p1 = pneg %p1138_p12 }
  0x46   : > { %p1146_p7 = pnand %p1145_p6, %p1139_p1 }
  0x48   : > { %1149 = shalt.err (!%p1146_p7)
}
  0x49   : > { %994 = dma.hbm_to_vmem [thread:$0]  (!%p1365_p0), %s314_s24, 256, %s316_s16, %s1377_s17, %s1574_s15, %s1574_s15, %s1238_s21  }
  0x4a   : > { %327 = sbr.rel (%p1394_p4) target bundleno = 1016 (0x3f8), region = 48  ;;  %s1435_s18 = sand.u32 (!%p1394_p4), 1, %s1218_s25  }
  0x4b   : > { %s1438_s20 = sshll.u32 (!%p1394_p4), %s1435_s18, 4  ;;  %s330_s11 = scalar_lea.sflag (!%p1394_p4), [#allocation5], %s1435_s18 }
  0x4c   : > { %s333_s12 = scalar_lea.vmem (!%p1394_p4), [#allocation4], %s1438_s20 }
  0x4f   : > { %1201 = dma.done.wait (%p1338_p8), %s330_s11, 256  }
  0x50   : > { %1203 = vsyncadd (%p1338_p8), %s330_s11, 4294967040  ;;  %s338_s24 = sand.u32 1, %s1318_s30   ;;  %s342_s19 = scalar_lea.vmem [#allocation7], %s1438_s20 }
  0x51   : > { %s339_s17 = scalar_lea.sflag [#allocation8], %s338_s24 }
  0x52   : > { %1205 = dma.done.wait (%p1338_p8), %s339_s17, 512  }
  0x53   : > { %1207 = vsyncadd (%p1338_p8), %s339_s17, 4294966784  ;;  %v1241_v0 = vmov 0.0   ;;  %vm1242_vm0 = vmmov 0   ;;  %v1243_v1 = vmov 0   ;;  %v400_v2 = vld [vmem:[%s342_s19 + $0x8] sm:$0xff]  ;;  %v399_v3 = vld [vmem:[%s342_s19] sm:$0xff] }
  0x54   : > { %953 = vmatprep.subr.mxu0 %v1241_v0  ;;  %957 = vmatprep.mubr.msk.f32.mxu0 %vm1242_vm0, %v1241_v0  ;;  %v398_v4 = vld [vmem:[%s1543_s3] sm:$0xff]  ;;  %vm407_vm1 = vcmask 130048   ;;  %vm563_vm2 = vcmask 261120   ;;  %v567_v12 = vld [vmem:[%s333_s12 + $0x8] sm:$0xff]  ;;  %s351_s9 = scalar_lea.vmem [#allocation9], %s1438_s20  ;;  %vm654_vm3 = vcmask 64512  }
  0x55   : > { %1056 = vset.pattern.permute.xlu0 %v1243_v1  ;;  %960 = vmatprep.subr.mxu1 %v1241_v0  ;;  %v401_v5 = vld [vmem:[%s1544_s4] sm:$0xff]  ;;  %v483_v13 = vld [vmem:[%s351_s9 + $0x8] sm:$0xff]  ;;  %s391_s22 = scalar_lea.vmem [#allocation10], %s1438_s20  ;;  %s940_s1 = sshll.u32 %s1226_s27, 8 }
  0x56   : > { %964 = vmatprep.mubr.msk.f32.mxu1 %vm1242_vm0, %v1241_v0  ;;  %1057 = vset.pattern.permute.xlu1 %v1243_v1  ;;  %v566_v6 = vld [vmem:[%s333_s12] sm:$0xff]  ;;  %s777_s8 = sshll.u32 %s391_s22, 4  ;;  %s1576_s12 = sld [smem:[#allocation21_spill]]  ;;  %s1485_s8 = int_to_ptr.vmem [resolvable:$true] %s777_s8 }
  0x57   : > { %954 = vmatpush3.msra.mxu0 %v400_v2  ;;  %404 = vperm.xlu0 %1056, %v401_v5   ;;  %v482_v14 = vld [vmem:[%s351_s9] sm:$0xff]  ;;  %s762_s17 = scalar_lea.sflag [#allocation6], %s1435_s18  ;;  %s1150_s20 = scalar_lea.vmem %s1485_s8, 256 }
  0x58   : > { %955 = vmatprep.subr.mxu0 %v1241_v0  ;;  %961 = vmatpush3.msra.mxu1 %v483_v13  ;;  %v481_v15 = vld [vmem:[%s1545_s5] sm:$0xff]  ;;  %p1151_p8 = scmp.ne.s32.totalorder %s1485_s8, %s1150_s20  ;;  %s1244_s27 = smov [#allocation10]  }
  0x59   : > { %956 = vmatpush3.msra.mxu0 %v399_v3  ;;  %962 = vmatprep.subr.mxu1 %v1241_v0  ;;  %v484_v32 = vld [vmem:[%s1546_s6] sm:$0xff]  ;;  %s1154_s19 = sshll.u32 %s1244_s27, 4  ;;  %s1155_s19 = int_to_ptr.vmem [resolvable:$false] %s1154_s19 }
  0x5a   : > { %958 = vmatmul.mubr.msk.f32.vlgmr.msra.gmra.mxu0 %vm407_vm1, %v398_v4  ;;  %963 = vmatpush3.msra.mxu1 %v482_v14  ;;  %p1152_p0 = pnand %p1151_p8, %p1342_p9  ;;  %s1156_s30 = scalar_lea.vmem %s1155_s19, 512 }
  0x5b   : > { %969 = vmatprep.mubr.msk.f32.mxu0 %vm563_vm2, %v566_v6  ;;  %965 = vmatmul.mubr.msk.f32.vlgmr.msra.gmra.mxu1 %vm407_vm1, %v481_v15  ;;  %p1157_p4 = scmp.lt.s32.totalorder %s1485_s8, %s1155_s19  ;;  %p1158_p10 = scmp.lt.s32.totalorder %s1156_s30, %s1150_s20 }
  0x5c   : > { %s1490_s24 = scalar_lea.hbm %s1576_s12, %s940_s1  ;;  %p1153_p3 = pneg %p1152_p0 }
  0x5d   : > { %p1159_p13 = por %p1158_p10, %p1157_p4 }
  0x5f   : > { %p1160_p12 = pnand %p1159_p13, %p1153_p3 }
  0xd2   : > { %v405_v7 = vpop.permute.xlu0 %404 }
 0x11a   : > { %v477_v8 = vpop.f32.mrf.mxu0 }
 0x11b   : > { %v478_v9 = vadd.f32 %v477_v8, %v405_v7  ;;  %v559_v30 = vpop.f32.mrf.mxu1 }
 0x11c   : > { %v959_v10 = vpop.f32.mrf.mxu0 }
 0x11d   : > { %564 = vst.msk [vmem:[#allocation2] sm:$0xff] %vm563_vm2, %v478_v9  ;;  %v966_v31 = vpop.f32.mrf.mxu1 }
 0x124   : > { %v568_v11 = vld [vmem:[#allocation2] sm:$0xff] }
 0x125   : > { %967 = vmatprep.subr.msk.mxu0 %vm563_vm2, %v568_v11 }
 0x126   : > { %968 = vmatpush3.xpose.msk.msra.mxu0 %vm563_vm2, %v568_v11 }
 0x129   : > { %970 = vmatmul.mubr.msk.f32.vlgmr.msra.gmra.mxu0 %vm563_vm2, %v567_v12 }
 0x1e9   : > { %v971_v16 = vpop.f32.mrf.mxu0 }
 0x1ea   : > { %v658_v17 = vsel %vm654_vm3, %v971_v16, -inf }
 0x1eb   : > { %659 = vmax.xlane.f32.xlu1 %v658_v17  ;;  %v645_v18 = vpop.f32.mrf.mxu0 }
 0x1ec   : > { %v655_v19 = vsel %vm654_vm3, %v645_v18, -inf }
 0x1ed   : > { %656 = vmax.xlane.f32.xlu0 %v655_v19 }
 0x274   : > { %v660_v20 = vpop.xlane.xlu1 %659 }
 0x275   : > { %v662_v21 = vsub.f32 %v971_v16, %v660_v20 }
 0x276   : > { %v657_v22 = vpop.xlane.xlu0 %656 }
 0x277   : > { %v665_v23 = vmul.f32 1.442695, %v662_v21  ;;  %v661_v24 = vsub.f32 %v645_v18, %v657_v22 }
 0x279   : > { %1058 = vpow2.f32 %v665_v23  ;;  %v663_v25 = vmul.f32 1.442695, %v661_v24 }
 0x27b   : > { %1060 = vpow2.f32 %v663_v25 }
 0x286   : > { %v1059_v26 = vpop.eup %1058 }
 0x287   : > { %v670_v27 = vsel %vm654_vm3, %v1059_v26, 0.0 }
 0x288   : > { %v1061_v28 = vpop.eup %1060  ;;  %671 = vadd.xlane.f32.xlu1 %v670_v27 }
 0x289   : > { %v667_v29 = vsel %vm654_vm3, %v1061_v28, 0.0 }
 0x28c   : > { %668 = vadd.xlane.f32.xlu1 %v667_v29 }
 0x29d   : > { %487 = vperm.xlu1 %1057, %v484_v32  }
 0x311   : > { %v672_v33 = vpop.xlane.xlu1 %671 }
 0x312   : > { %1062 = vrcp.f32 %v672_v33 }
 0x315   : > { %v669_v34 = vpop.xlane.xlu1 %668 }
 0x316   : > { %1064 = vrcp.f32 %v669_v34 }
 0x319   : > { %v488_v35 = vpop.permute.xlu1 %487 }
 0x31a   : > { %v560_v36 = vadd.f32 %v559_v30, %v488_v35 }
 0x31c   : > { %565 = vst.msk [vmem:[#allocation3] sm:$0xff] %vm563_vm2, %v560_v36 }
 0x31f   : > { %v1063_v37 = vpop.eup %1062 }
 0x320   : > { %v676_v41 = vmul.f32 %v1063_v37, %v1059_v26 }
 0x323   : > { %v1065_v38 = vpop.eup %1064  ;;  %v677_v39 = vld [vmem:[#allocation3] sm:$0xff] }
 0x324   : > { %972 = vmatprep.subr.mxu1 %v677_v39  ;;  %v675_v40 = vmul.f32 %v1065_v38, %v1061_v28 }
 0x325   : > { %973 = vmatpush3.msra.mxu1 %v677_v39 }
 0x326   : > { %974 = vmatprep.mubr.msk.f32.mxu1 %vm654_vm3, %v675_v40 }
 0x327   : > { %975 = vmatmul.mubr.msk.f32.vlgmr.msra.gmra.mxu1 %vm654_vm3, %v676_v41 }
 0x3e7   : > { %v976_v42 = vpop.f32.mrf.mxu1 }
 0x3e8   : > { %760 = vst.msk [vmem:[%s391_s22 + $0x8] sm:$0xff] %vm563_vm2, %v976_v42 }
 0x3e9   : > { %v750_v43 = vpop.f32.mrf.mxu1 }
 0x3ea   : > { %759 = vst.msk [vmem:[%s391_s22] sm:$0xff] %vm563_vm2, %v750_v43 }
 0x3eb   : > { %1163 = shalt.err (!%p1160_p12)
}
 0x3ec   : > { %s1164_s21 = scalar_lea.hbm %s1490_s24, 256  ;;  %s1168_s9 = scalar_lea.hbm %s1576_s12, 512 }
 0x3ed   : > { %p1165_p1 = scmp.ne.s32.totalorder %s1490_s24, %s1164_s21  ;;  %p1169_p6 = scmp.lt.s32.totalorder %s1490_s24, %s1576_s12 }
 0x3ee   : > { %p1170_p7 = scmp.lt.s32.totalorder %s1168_s9, %s1164_s21 }
 0x3ef   : > { %p1166_p2 = pnand %p1165_p1, %p1342_p9 }
 0x3f0   : > { %p1171_p8 = por %p1170_p7, %p1169_p6 }
 0x3f1   : > { %p1167_p5 = pneg %p1166_p2 }
 0x3f3   : > { %p1172_p0 = pnand %p1171_p8, %p1167_p5 }
 0x3f5   : > { %1175 = shalt.err (!%p1172_p0)
}
 0x3f6   : > { %s1245_s16 = smov 128   ;;  %s1246_s10 = smov 8  }
 0x3f7   : > { %983 = dma.vmem_to_hbm [thread:$0]  (%p1342_p9), %s1485_s8, 256, %s1490_s24, %s762_s17, %s1245_s16, %s1245_s16, %s1246_s10  }
 0x3f8 PF: > { %s1577_s22 = sld [smem:[#allocation14_spill]]  ;;  %p1579_p3 = scmp.ge.s32.totalorder %s1234_s29, 2 }
 0x3fa   : > { %p996_p4 = pnand %p1579_p3, %p1349_p11 }
 0x3fc   : > { %p997_p10 = pneg %p996_p4 }
 0x3fe   : > { %s792_s14 = sand.u32 1, %s1577_s22  }
 0x3ff   : > { %s793_s11 = scalar_lea.sflag [#allocation6], %s792_s14 }
 0x400   : > { %1209 = dma.done.wait (%p997_p10), %s793_s11, 256  }
 0x401   : > { %1211 = vsyncadd (%p997_p10), %s793_s11, 4294967040  ;;  %s26_s29 = sadd.s32 1, %s1234_s29   ;;  %s1580_s23 = sld [smem:[#allocation18_spill]] }
 0x402   : > { %p23_p13 = scmp.ge.s32.totalorder %s26_s29, 4   ;;  %s1581_s27 = sld [smem:[#allocation15_spill]] }
 0x403   : > { %s1582_s28 = sld [smem:[#allocation16_spill]]  ;;  %s1583_s24 = smov %s1218_s25 }
 0x404   : > { %s1584_s25 = smov %s1222_s26  ;;  %25 = sbr.rel (!%p23_p13) target bundleno = 11 (0xb), region = 121 }
 0x407   : > { %s1585_s26 = smov %s1580_s23 }
 0x409   :  { %798 = vsyncpa [#allocation5], 1 }
 0x40a   :  { %800 = vsyncpa [#allocation5 + $0x1], 1 }
 0x40b   :  { %801 = vsyncpa [#allocation8], 1 }
 0x40c   :  { %803 = vsyncpa [#allocation8 + $0x1], 1 }
 0x40d   :  { %804 = vsyncpa [#allocation6], 1 }
 0x40e   :  { %806 = vsyncpa [#allocation6 + $0x1], 1 }

</bundles_post_ra>
